<compile_context>
chip_gen: v7x
topology: tpu7x:2x2x1
jax: 0.10.0
libtpu: 0.0.40
codegen_flags: <defaults>
</compile_context>

<pallas_src>
import functools

import jax
import jax.numpy as jnp
from jax.experimental import pallas as pl
from jax.experimental.pallas import tpu as pltpu


def _round_up(x, m):
    return ((x + m - 1) // m) * m


def _cdiv(a, b):
    return -(-a // b)


def _sublane_multiple(dtype):
    # 8 for 32-bit, 16 for 16-bit, 32 for 8-bit dtypes.
    bits = jnp.dtype(dtype).itemsize * 8
    return max(8, 256 // bits)


def _vmem_limit_bytes():
    cap = None
    try:
        info = pltpu.get_tpu_info()
        cap = getattr(info, "vmem_capacity_bytes", None)
    except Exception:
        cap = None
    if not cap:
        cap = 64 * 1024 * 1024  # conservative fallback (v7x per-TC size)
    # Leave headroom for compiler/internal scratch: 112 MiB on 128 MiB parts,
    # 48 MiB on 64 MiB parts.
    return max(cap - 16 * 1024 * 1024, 32 * 1024 * 1024)


def _vmem_estimate(bm, bk, c_pad, x_bytes, w_bytes, out_bytes, use_scratch):
    u = 2 * bm * bk * x_bytes          # x tile (double-buffered)
    u += 2 * bk * c_pad * w_bytes      # weight K-slab (double-buffered)
    u += 2 * 1 * c_pad * w_bytes       # bias (tiny)
    u += 2 * bm * c_pad * out_bytes    # output block (resident across K)
    if use_scratch:
        u += bm * c_pad * 4            # f32 accumulator
    return u


def _kernel_inplace(x_ref, w_ref, b_ref, o_ref):
    # float32 output: accumulate the matmul directly into the resident output block
    # (saves a bm*c_pad*4 byte VMEM scratch).
    k = pl.program_id(1)

    @pl.when(k == 0)
    def _():
        o_ref[...] = jnp.zeros_like(o_ref)

    o_ref[...] += jnp.dot(x_ref[...], w_ref[...],
                          preferred_element_type=jnp.float32)

    @pl.when(k == pl.num_programs(1) - 1)
    def _():
        logits = o_ref[...] + b_ref[...].astype(jnp.float32)
        m = jnp.max(logits, axis=-1, keepdims=True)
        shifted = logits - m
        lse = jnp.log(jnp.sum(jnp.exp(shifted), axis=-1, keepdims=True))
        o_ref[...] = shifted - lse


def _kernel_scratch(x_ref, w_ref, b_ref, o_ref, acc_ref):
    # Low-precision output: accumulate in an f32 VMEM scratch, cast only at the final store.
    k = pl.program_id(1)

    @pl.when(k == 0)
    def _():
        acc_ref[...] = jnp.zeros_like(acc_ref)

    acc_ref[...] += jnp.dot(x_ref[...], w_ref[...],
                            preferred_element_type=jnp.float32)

    @pl.when(k == pl.num_programs(1) - 1)
    def _():
        logits = acc_ref[...] + b_ref[...].astype(jnp.float32)
        m = jnp.max(logits, axis=-1, keepdims=True)
        shifted = logits - m
        lse = jnp.log(jnp.sum(jnp.exp(shifted), axis=-1, keepdims=True))
        o_ref[...] = (shifted - lse).astype(o_ref.dtype)


def prepare_params(w_t, b, *, block_k=512, mxu_dtype=None):
    """Pad (and optionally cast for the MXU) the weight/bias ONCE at init.

    w_t: (input_dim, nclass) -- transpose of the PyTorch nn.Linear weight.
    b:   (nclass,) or (1, nclass)
    """
    input_dim, nclass = w_t.shape
    if mxu_dtype is not None:
        w_t = w_t.astype(mxu_dtype)
    bk = min(block_k, _round_up(input_dim, 128))
    d_pad = _round_up(input_dim, bk)
    c_pad = _round_up(nclass, 128)          # lane-dense class axis
    w_p = jnp.pad(w_t, ((0, d_pad - input_dim), (0, c_pad - nclass)))
    b2 = jnp.reshape(b, (1, -1))
    # Padded classes carry a hugely negative bias so they vanish under logsumexp.
    b_p = jnp.pad(b2, ((0, 0), (0, c_pad - nclass)), constant_values=-1e30)
    return w_p, b_p


@functools.partial(jax.jit, static_argnames=("nclass", "block_m", "block_k"))
def linear_logsoftmax(x, w_p, b_p, *, nclass, block_m=512, block_k=512):
    """x: (B, D); w_p/b_p: pre-padded params from prepare_params(). -> (B, nclass) log-probs."""
    batch, input_dim = x.shape
    d_pad, c_pad = w_p.shape
    assert input_dim <= d_pad and nclass <= c_pad

    out_dtype = x.dtype
    mxu_dtype = w_p.dtype
    use_scratch = out_dtype != jnp.float32

    # ---- tile selection -------------------------------------------------
    sub = _sublane_multiple(mxu_dtype)
    bm_cap = min(block_m, _round_up(batch, sub))
    n_m = _cdiv(batch, bm_cap)
    bm = min(bm_cap, _round_up(_cdiv(batch, n_m), sub))   # balanced batch tiles

    bk = min(block_k, d_pad)
    if d_pad % bk != 0:                                    # mismatched block_k fallback
        bk = d_pad

    vmem_limit = _vmem_limit_bytes()
    budget = vmem_limit - 2 * 1024 * 1024
    x_bytes = jnp.dtype(mxu_dtype).itemsize
    w_bytes = jnp.dtype(mxu_dtype).itemsize
    out_bytes = jnp.dtype(out_dtype).itemsize
    # Shrink bk first (bm buys arithmetic intensity on the streamed weight), then bm.
    while _vmem_estimate(bm, bk, c_pad, x_bytes, w_bytes, out_bytes, use_scratch) > budget:
        if bk > 256 and (bk // 2) % 128 == 0 and d_pad % (bk // 2) == 0:
            bk //= 2
        elif bm > sub:
            bm = max(sub, (bm // 2) // sub * sub)
        else:
            break

    b_pad = _round_up(batch, bm)

    # ---- per-call input padding (weights/bias were padded once at init) --
    x_p = x.astype(mxu_dtype) if x.dtype != mxu_dtype else x
    x_p = jnp.pad(x_p, ((0, b_pad - batch), (0, d_pad - input_dim)))

    grid = (b_pad // bm, d_pad // bk)       # (batch tiles [parallel], K tiles [arbitrary])

    kernel = _kernel_scratch if use_scratch else _kernel_inplace
    scratch = [pltpu.VMEM((bm, c_pad), jnp.float32)] if use_scratch else []

    out_p = pl.pallas_call(
        kernel,
        out_shape=jax.ShapeDtypeStruct((b_pad, c_pad), out_dtype),
        grid_spec=pltpu.PrefetchScalarGridSpec(
            num_scalar_prefetch=0,
            grid=grid,
            in_specs=[
                pl.BlockSpec((bm, bk), lambda i, k: (i, k)),      # x tile
                pl.BlockSpec((bk, c_pad), lambda i, k: (k, 0)),   # weight K-slab
                pl.BlockSpec((1, c_pad), lambda i, k: (0, 0)),    # bias (grid-invariant)
            ],
            out_specs=pl.BlockSpec((bm, c_pad), lambda i, k: (i, 0)),
            scratch_shapes=scratch,
        ),
        compiler_params=pltpu.CompilerParams(
            dimension_semantics=("parallel", "arbitrary"),
            vmem_limit_bytes=vmem_limit,
        ),
    )(x_p, w_p, b_p)

    return out_p[:batch, :nclass]


def init_params(key, input_dim, nclass, dtype=jnp.float32):
    """Deterministic init mimicking nn.Linear's default uniform(-1/sqrt(D), 1/sqrt(D))."""
    kw, kb = jax.random.split(key)
    bound = 1.0 / jnp.sqrt(jnp.asarray(input_dim, dtype=jnp.float32))
    # PyTorch weight is (nclass, input_dim); we store its transpose (input_dim, nclass).
    w_t = jax.random.uniform(kw, (input_dim, nclass), dtype=dtype,
                             minval=-bound, maxval=bound)
    b = jax.random.uniform(kb, (1, nclass), dtype=dtype,
                           minval=-bound, maxval=bound)
    return w_t, b


def reference(x, w_t, b):
    logits = x @ w_t + b
    return jax.nn.log_softmax(logits, axis=1)


if __name__ == "__main__":
    key = jax.random.PRNGKey(0)
    k_x, k_p = jax.random.split(key)

    batch, input_dim, nclass = 8, 32, 16
    x = jax.random.normal(k_x, (batch, input_dim), dtype=jnp.float32)
    w_t, b = init_params(k_p, input_dim, nclass)

    # Pad the parameters once at init (no per-forward weight copy). For bandwidth-bound
    # deployments pass mxu_dtype=jnp.bfloat16 here to halve weight HBM traffic.
    w_p, b_p = prepare_params(w_t, b)

    out = linear_logsoftmax(x, w_p, b_p, nclass=nclass)
    out = jax.block_until_ready(out)

    ref = reference(x, w_t, b)
    assert out.shape == (batch, nclass)
    assert jnp.allclose(out, ref, atol=1e-5, rtol=1e-5), "mismatch vs reference"

    # TODO(synk): nn.NLLLoss (self.lossfunction) is a training-time loss, not part of forward().
    print("KERNEL_OK")
</pallas_src>

<mosaic_0001>
module attributes {stable_mosaic.version = 11 : i64} {
  func.func @_kernel_inplace(%arg0: i32, %arg1: i32, %arg2: memref<8x128xf32, #tpu.memory_space<vmem>>, %arg3: memref<128x128xf32, #tpu.memory_space<vmem>>, %arg4: memref<1x128xf32, #tpu.memory_space<vmem>>, %arg5: memref<8x128xf32, #tpu.memory_space<vmem>>) attributes {dimension_semantics = [#tpu.dimension_semantics<parallel>, #tpu.dimension_semantics<arbitrary>], iteration_bounds = array<i64: 1, 1>, scalar_prefetch = 0 : i64, scratch_operands = 0 : i64, tpu.core_type = #tpu.core_type<tc>, window_params = [{transform_indices = @transform_0, window_bounds = array<i64: 8, 128>}, {transform_indices = @transform_1, window_bounds = array<i64: 128, 128>}, {pipeline_mode = #tpu.pipeline_mode<synchronous>, transform_indices = @transform_2, window_bounds = array<i64: 1, 128>}, {transform_indices = @transform_3, window_bounds = array<i64: 8, 128>}]} {
    %c0_i32 = arith.constant 0 : i32
    %0 = arith.cmpi eq, %arg1, %c0_i32 : i32
    %1 = arith.extui %0 : i1 to i32
    %c0_i32_0 = arith.constant 0 : i32
    %2 = arith.cmpi ne, %1, %c0_i32_0 : i32
    scf.if %2 {
      %cst_10 = arith.constant 0.000000e+00 : f32
      %12 = vector.broadcast %cst_10 : f32 to vector<8x128xf32>
      %c0_11 = arith.constant 0 : index
      %c0_12 = arith.constant 0 : index
      %13 = vector.load %arg5[%c0_11, %c0_12] : memref<8x128xf32, #tpu.memory_space<vmem>>, vector<8x128xf32>
      tpu.vector_store %arg5[%c0_11, %c0_12], %12 {strides = array<i32>} : memref<8x128xf32, #tpu.memory_space<vmem>>, vector<8x128xf32>,
    } else {
    }
    %c0 = arith.constant 0 : index
    %c0_1 = arith.constant 0 : index
    %3 = vector.load %arg5[%c0, %c0_1] : memref<8x128xf32, #tpu.memory_space<vmem>>, vector<8x128xf32>
    %c0_2 = arith.constant 0 : index
    %c0_3 = arith.constant 0 : index
    %4 = vector.load %arg2[%c0_2, %c0_3] : memref<8x128xf32, #tpu.memory_space<vmem>>, vector<8x128xf32>
    %c0_4 = arith.constant 0 : index
    %c0_5 = arith.constant 0 : index
    %5 = vector.load %arg3[%c0_4, %c0_5] : memref<128x128xf32, #tpu.memory_space<vmem>>, vector<128x128xf32>
    %cst = arith.constant dense<0.000000e+00> : vector<8x128xf32>
    %6 = tpu.matmul %4, %5, %cst {dimension_numbers = #tpu.dot_dimension_numbers<[1], [0], [0], [1], [0, 0, 1, 1], [], []>} : vector<8x128xf32>, vector<128x128xf32>, vector<8x128xf32> -> vector<8x128xf32>
    %7 = arith.addf %3, %6 : vector<8x128xf32>
    %c0_6 = arith.constant 0 : index
    %c0_7 = arith.constant 0 : index
    %8 = vector.load %arg5[%c0_6, %c0_7] : memref<8x128xf32, #tpu.memory_space<vmem>>, vector<8x128xf32>
    tpu.vector_store %arg5[%c0_6, %c0_7], %7 {strides = array<i32>} : memref<8x128xf32, #tpu.memory_space<vmem>>, vector<8x128xf32>,
    %c0_i32_8 = arith.constant 0 : i32
    %9 = arith.cmpi eq, %arg1, %c0_i32_8 : i32
    %10 = arith.extui %9 : i1 to i32
    %c0_i32_9 = arith.constant 0 : i32
    %11 = arith.cmpi ne, %10, %c0_i32_9 : i32
    scf.if %11 {
      %c0_10 = arith.constant 0 : index
      %c0_11 = arith.constant 0 : index
      %12 = vector.load %arg5[%c0_10, %c0_11] : memref<8x128xf32, #tpu.memory_space<vmem>>, vector<8x128xf32>
      %c0_12 = arith.constant 0 : index
      %c0_13 = arith.constant 0 : index
      %13 = vector.load %arg4[%c0_12, %c0_13] : memref<1x128xf32, #tpu.memory_space<vmem>>, vector<1x128xf32>
      %14 = vector.broadcast %13 : vector<1x128xf32> to vector<8x128xf32>
      %15 = arith.addf %12, %14 : vector<8x128xf32>
      %cst_14 = arith.constant dense<0xFF800000> : vector<8xf32>
      %16 = vector.multi_reduction <maximumf>, %15, %cst_14 [1] : vector<8x128xf32> to vector<8xf32>
      %17 = vector.shape_cast %16 : vector<8xf32> to vector<8x1xf32>
      %18 = vector.broadcast %17 : vector<8x1xf32> to vector<8x128xf32>
      %19 = arith.subf %15, %18 : vector<8x128xf32>
      %20 = math.exp %19 : vector<8x128xf32>
      %cst_15 = arith.constant dense<0.000000e+00> : vector<8xf32>
      %21 = vector.multi_reduction <add>, %20, %cst_15 [1] : vector<8x128xf32> to vector<8xf32>
      %22 = vector.shape_cast %21 : vector<8xf32> to vector<8x1xf32>
      %23 = math.log %22 : vector<8x1xf32>
      %24 = vector.broadcast %23 : vector<8x1xf32> to vector<8x128xf32>
      %25 = arith.subf %19, %24 : vector<8x128xf32>
      %c0_16 = arith.constant 0 : index
      %c0_17 = arith.constant 0 : index
      %26 = vector.load %arg5[%c0_16, %c0_17] : memref<8x128xf32, #tpu.memory_space<vmem>>, vector<8x128xf32>
      tpu.vector_store %arg5[%c0_16, %c0_17], %25 {strides = array<i32>} : memref<8x128xf32, #tpu.memory_space<vmem>>, vector<8x128xf32>,
    } else {
    }
    return
  }
  func.func @transform_0(%arg0: i32, %arg1: i32) -> (i32, i32) {
    %c0_i32 = arith.constant 0 : i32
    return %arg0, %arg1 : i32, i32
  }
  func.func @transform_1(%arg0: i32, %arg1: i32) -> (i32, i32) {
    %c0_i32 = arith.constant 0 : i32
    %c0_i32_0 = arith.constant 0 : i32
    return %arg1, %c0_i32 : i32, i32
  }
  func.func @transform_2(%arg0: i32, %arg1: i32) -> (i32, i32) {
    %c0_i32 = arith.constant 0 : i32
    %c0_i32_0 = arith.constant 0 : i32
    %c0_i32_1 = arith.constant 0 : i32
    return %c0_i32, %c0_i32_0 : i32, i32
  }
  func.func @transform_3(%arg0: i32, %arg1: i32) -> (i32, i32) {
    %c0_i32 = arith.constant 0 : i32
    %c0_i32_0 = arith.constant 0 : i32
    return %arg0, %c0_i32 : i32, i32
  }
}

</mosaic_0001>

<bundles_post_ra>
// kernel: linear_logsoftmax.1
= control target key start
LH: loop header
LB: loop body
LE: loop exit
PB: predicated region body
PF: predicated region fallthrough
CT: control target
= control target key end

     0   :  { %8 = vsyncpa [#allocation3], 0  ;;  %s355_s0 = inlined_call_operand.vmem [shape: f32[8,128], index: 0, kind: input, shape index: {}]   ;;  %s356_s1 = inlined_call_operand.hbm [shape: f32[128,128], index: 1, kind: input, shape index: {}]   ;;  %s357_s2 = inlined_call_operand.vmem [shape: f32[1,128], index: 2, kind: input, shape index: {}]   ;;  %s358_s3 = inlined_call_operand.hbm [shape: f32[8,128], index: 3, kind: output, shape index: {}]  }
   0x1   :  { %9 = vsyncpa [#allocation4], 0  ;;  %s298_s12 = smov [#allocation2]   ;;  %s250_s16 = scalar_lea.hbm %s356_s1, 2048 }
   0x2   :  { %s17_s13 = sshll.u32 %s298_s12, 4  ;;  %p251_p0 = scmp.ne.s32.totalorder %s356_s1, %s250_s16  ;;  %s18_s13 = int_to_ptr.vmem [resolvable:$true] %s17_s13 }
   0x3   :  { %p254_p1 = scmp.lt.u32.totalorder %s250_s16, %s356_s1 }
   0x5   :  { %p256_p2 = pnand %p254_p1, %p251_p0 }
   0x7   :  { %259 = shalt.err (!%p256_p2)
}
   0x8   :  { %s260_s21 = scalar_lea.vmem %s18_s13, 2048  ;;  %p265_p4 = scmp.lt.s32.totalorder %s18_s13, %s18_s13 }
   0x9   :  { %p261_p3 = scmp.ne.s32.totalorder %s18_s13, %s260_s21  ;;  %p266_p5 = scmp.lt.s32.totalorder %s260_s21, %s260_s21 }
   0xb   :  { %p267_p6 = por %p266_p5, %p265_p4 }
   0xd   :  { %p268_p7 = pnand %p267_p6, %p261_p3 }
   0xf   :  { %271 = shalt.err (!%p268_p7)
}
  0x10   :  { %s299_s22 = smov 128   ;;  %s300_s23 = smov 8  }
  0x11   :  { %23 = dma.hbm_to_vmem [thread:$0]  %s356_s1, 2048, %s18_s13, [#allocation3], %s299_s22, %s299_s22, %s300_s23  }
  0x12   :  { %294 = dma.done.wait [#allocation3], 2048  }
  0x13   :  { %295 = vsyncadd [#allocation3], 4294965248  ;;  %v301_v0 = vmov 0.0|0.0   ;;  %vm302_vm0 = vmmov 0   ;;  %v303_v1 = vmov 0.0   ;;  %v36_v2 = vld [vmem:[#allocation2] sm:$0xff] }
  0x14   :  { %215 = vmatprep.subr.bf16.mxu0 %v301_v0  ;;  %212 = vmatprep.mubr.msk.f32.mxu0 %vm302_vm0, %v303_v1  ;;  %v37_v3 = vld [vmem:[#allocation2 + $0x8] sm:$0xff]  ;;  %v38_v4 = vld [vmem:[#allocation2 + $0x10] sm:$0xff]  ;;  %v39_v6 = vld [vmem:[#allocation2 + $0x18] sm:$0xff]  ;;  %s304_s29 = smov [#allocation5]  }
  0x15   :  { %v216_v5 = vpack.c.bf16 %v37_v3, %v36_v2  ;;  %v219_v7 = vpack.c.bf16 %v39_v6, %v38_v4  ;;  %v40_v8 = vld [vmem:[#allocation2 + $0x20] sm:$0xff]  ;;  %v41_v9 = vld [vmem:[#allocation2 + $0x28] sm:$0xff]  ;;  %v42_v11 = vld [vmem:[#allocation2 + $0x30] sm:$0xff] }
  0x16   :  { %v222_v10 = vpack.c.bf16 %v41_v9, %v40_v8  ;;  %v43_v12 = vld [vmem:[#allocation2 + $0x38] sm:$0xff]  ;;  %v44_v14 = vld [vmem:[#allocation2 + $0x40] sm:$0xff]  ;;  %v45_v15 = vld [vmem:[#allocation2 + $0x48] sm:$0xff] }
  0x17   :  { %217 = vmatpush3.bf16.msra.mxu0 %v216_v5  ;;  %v225_v13 = vpack.c.bf16 %v43_v12, %v42_v11  ;;  %v228_v16 = vpack.c.bf16 %v45_v15, %v44_v14  ;;  %v46_v17 = vld [vmem:[#allocation2 + $0x50] sm:$0xff]  ;;  %v47_v18 = vld [vmem:[#allocation2 + $0x58] sm:$0xff]  ;;  %v48_v20 = vld [vmem:[#allocation2 + $0x60] sm:$0xff] }
  0x18   :  { %218 = vmatprep.subr.bf16.mxu0 %v301_v0  ;;  %v231_v19 = vpack.c.bf16 %v47_v18, %v46_v17  ;;  %v49_v21 = vld [vmem:[#allocation2 + $0x68] sm:$0xff]  ;;  %v50_v23 = vld [vmem:[#allocation2 + $0x70] sm:$0xff]  ;;  %v51_v24 = vld [vmem:[#allocation2 + $0x78] sm:$0xff] }
  0x19   :  { %v234_v22 = vpack.c.bf16 %v49_v21, %v48_v20  ;;  %v237_v25 = vpack.c.bf16 %v51_v24, %v50_v23  ;;  %v35_v26 = vld [vmem:[%s355_s0] sm:$0xff]  ;;  %s153_s0 = sshll.u32 %s304_s29, 4  ;;  %s154_s0 = int_to_ptr.vmem [resolvable:$true] %s153_s0 }
  0x1a   :  { %v162_v28 = vld [vmem:[%s357_s2] ss:$0 sm:$0xff]  ;;  %s272_s30 = scalar_lea.vmem %s154_s0, 128  ;;  %p277_p9 = scmp.lt.s32.totalorder %s154_s0, %s154_s0 }
  0x1b   :  { %220 = vmatpush3.bf16.msra.mxu0 %v219_v7  ;;  %p273_p8 = scmp.ne.s32.totalorder %s154_s0, %s272_s30  ;;  %p278_p10 = scmp.lt.s32.totalorder %s272_s30, %s272_s30 }
  0x1c   :  { %221 = vmatprep.subr.bf16.mxu0 %v301_v0 }
  0x1d   :  { %p279_p11 = por %p278_p10, %p277_p9 }
  0x1f   :  { %223 = vmatpush3.bf16.msra.mxu0 %v222_v10  ;;  %p280_p12 = pnand %p279_p11, %p273_p8 }
  0x20   :  { %224 = vmatprep.subr.bf16.mxu0 %v301_v0 }
  0x23   :  { %226 = vmatpush3.bf16.msra.mxu0 %v225_v13 }
  0x24   :  { %227 = vmatprep.subr.bf16.mxu0 %v301_v0 }
  0x27   :  { %229 = vmatpush3.bf16.msra.mxu0 %v228_v16 }
  0x28   :  { %230 = vmatprep.subr.bf16.mxu0 %v301_v0 }
  0x2b   :  { %232 = vmatpush3.bf16.msra.mxu0 %v231_v19 }
  0x2c   :  { %233 = vmatprep.subr.bf16.mxu0 %v301_v0 }
  0x2f   :  { %235 = vmatpush3.bf16.msra.mxu0 %v234_v22 }
  0x30   :  { %236 = vmatprep.subr.bf16.mxu0 %v301_v0 }
  0x33   :  { %238 = vmatpush3.bf16.msra.mxu0 %v237_v25 }
  0x36   :  { %213 = vmatmul.mubr.f32.vlgmr.msra.gmra.mrb[0].mxu0 %v35_v26 }
 0x109   :  { %v118_v27 = vpop.f32.mrb[0].mxu0 }
 0x10a   :  { %v214_v29 = vpop.f32.mrb[1].mxu0  ;;  %v135_v30 = vadd.f32 %v162_v28, %v118_v27 }
 0x10c   :  { %136 = vmax.xlane.f32.xlu0 %v135_v30 }
 0x199   :  { %v137_v31 = vpop.xlane.xlu0 %136 }
 0x19a   :  { %v138_v32 = vsub.f32 %v135_v30, %v137_v31 }
 0x19c   :  { %v139_v33 = vmul.f32 1.442695, %v138_v32 }
 0x19e   :  { %246 = vpow2.f32 %v139_v33 }
 0x1a8   :  { %v247_v34 = vpop.eup %246 }
 0x1a9   :  { %141 = vadd.xlane.f32.xlu0 %v247_v34 }
 0x236   :  { %v142_v35 = vpop.xlane.xlu0 %141 }
 0x237   :  { %248 = vlog2.f32 %v142_v35 }
 0x241   :  { %v249_v36 = vpop.eup %248 }
 0x242   :  { %v144_v37 = vmul.f32 0.6931472, %v249_v36 }
 0x244   :  { %v145_v38 = vsub.f32 %v138_v32, %v144_v37 }
 0x246   :  { %146 = vst [vmem:[#allocation5] sm:$0xff] %v145_v38 }
 0x247   :  { %283 = shalt.err (!%p280_p12)
}
 0x248   :  { %s284_s5 = scalar_lea.hbm %s358_s3, 128 }
 0x249   :  { %p285_p13 = scmp.ne.s32.totalorder %s358_s3, %s284_s5  ;;  %p288_p0 = scmp.lt.u32.totalorder %s284_s5, %s358_s3 }
 0x24b   :  { %p290_p1 = pnand %p288_p0, %p285_p13 }
 0x24d   :  { %293 = shalt.err (!%p290_p1)
}
 0x24e   :  { %156 = dma.vmem_to_hbm [thread:$0]  %s154_s0, 128, %s358_s3, [#allocation4]  }
 0x24f   :  { %296 = dma.done.wait [#allocation4], 128  }
 0x250   :  { %297 = vsyncadd [#allocation4], 4294967168 }
 0x251   :  { %160 = vsyncpa [#allocation3], 1 }
 0x252   :  { %161 = vsyncpa [#allocation4], 1 }

</bundles_post_ra>
